<compile_context>
chip_gen: v5e
topology: v5e:2x2
jax: 0.10.0
libtpu: 0.0.40
codegen_flags: <defaults>
</compile_context>

<pallas_src>
import functools

import numpy as np
import jax
import jax.numpy as jnp
from jax.experimental import pallas as pl
from jax.experimental.pallas import tpu as pltpu

LANE = 128


def _round_up(n, m):
    return ((n + m - 1) // m) * m


def _dse_kernel(x_ref, w1_ref, b1_ref, thr_ref,
                wih_ref, bih_ref, whh_ref, bhh_ref,
                wrec_ref, brec_ref, h0_ref,
                slab_ref, *, e, d_pad, e_pad):
    def mm(a, w_ref):
        # Weights may be stored bf16 (pack_params dtype); cast activations at the
        # dot and accumulate in f32.  No-op cast when weights are f32.
        w = w_ref[...]
        return jnp.dot(a.astype(w.dtype), w, preferred_element_type=jnp.float32)

    x = x_ref[...]                       # (BM, D_P)
    h = h0_ref[...]                      # (BM, E_P), real lanes [0, e)

    # --- sparse_proj: Linear -> ReLU6 -> Dropout(0.1) (eval = identity) -> F.threshold
    pre = mm(x, w1_ref) + b1_ref[...]
    # Merged ReLU6 + F.threshold(enc, thr, 0): clip to 6, keep iff > max(thr, 0).
    # Exactly equivalent to clip(pre, 0, 6) followed by threshold for any thr
    # (including negative values).
    thr = jnp.maximum(thr_ref[0], 0.0)
    v6 = jnp.minimum(pre, 6.0)
    enc = jnp.where(v6 > thr, v6, 0.0)   # (BM, E_P); padded lanes stay exactly 0

    # --- per-row active count (padded lanes are exactly 0, so they never count).
    # The global sparsity = sum(count over the real B rows) / (B*E) is finished in
    # the wrapper; keeping it per-row makes the batch grid axis "parallel"-safe.
    count = jnp.sum((enc > 0.0).astype(jnp.float32), axis=-1, keepdims=True)  # (BM, 1)
    # TODO(synk): the PyTorch module also mutates self.threshold.data in-place
    # (compute_sparsity); that stateful parameter update is not reproduced here
    # (it does not affect the values returned by this forward call).

    # --- GRUCell (PyTorch gate order r, z, n).  Two compact (E_P x G_P) matmuls;
    # gates are packed contiguously in 3*e lanes (no per-gate 128-lane padding).
    gi = mm(enc, wih_ref) + bih_ref[...]   # (BM, G_P)
    gh = mm(h, whh_ref) + bhh_ref[...]     # (BM, G_P)
    r = jax.nn.sigmoid(gi[:, 0:e] + gh[:, 0:e])
    z = jax.nn.sigmoid(gi[:, e:2 * e] + gh[:, e:2 * e])
    n = jnp.tanh(gi[:, 2 * e:3 * e] + r * gh[:, 2 * e:3 * e])
    h_new = (1.0 - z) * n + z * h[:, 0:e]                      # (BM, e)

    # --- state block [ h_new | count | 0 ... ] (lane-dense, e_pad wide).
    # It is reused directly as the reconstruct matmul input: w_rec rows >= e are
    # zero, so the count lane contributes nothing to the output.
    bm = h_new.shape[0]
    hn_pad = jnp.concatenate(
        [h_new, jnp.zeros((bm, e_pad - e), jnp.float32)], axis=-1)   # (BM, E_P)
    lane = jax.lax.broadcasted_iota(jnp.int32, (bm, e_pad), 1)
    state_block = jnp.where(lane == e, count, hn_pad)                # count in lane e

    # --- reconstruction Linear
    out = mm(state_block, wrec_ref) + brec_ref[...]                  # (BM, D_P)

    # --- single lane-dense output slab: [ reconstructed | temporal_state+count ]
    slab_ref[:, 0:d_pad] = out
    slab_ref[:, d_pad:d_pad + e_pad] = state_block


def pack_params(params, dtype=jnp.float32):
    """One-time host-side packing: pad to 128 lanes (gates packed contiguously,
    NOT one 128-lane group per gate).  `dtype` applies to the matmul weights only
    (use jnp.bfloat16 on v6e/v7x to halve the weight HBM stream; note this changes
    numerics ~1e-3 relative).  Biases stay f32."""
    D, E = params["w1"].shape
    D_P = _round_up(D, LANE)
    E_P = _round_up(E, LANE)
    G_P = _round_up(3 * E, LANE)

    def pad(w, rows, cols, cast=False):
        z = jnp.zeros((rows, cols), jnp.float32).at[:w.shape[0], :w.shape[1]].set(w)
        return z.astype(dtype) if cast else z

    return dict(
        D=D, E=E, D_P=D_P, E_P=E_P, G_P=G_P,
        thr=params["thr"],
        w1=pad(params["w1"], D_P, E_P, cast=True),
        b1=pad(params["b1"], 1, E_P),
        w_ih=pad(params["w_ih"], E_P, G_P, cast=True),
        b_ih=pad(params["b_ih"], 1, G_P),
        w_hh=pad(params["w_hh"], E_P, G_P, cast=True),
        b_hh=pad(params["b_hh"], 1, G_P),
        w_rec=pad(params["w_rec"], E_P, D_P, cast=True),
        b_rec=pad(params["b_rec"], 1, D_P),
    )


def dynamic_sparse_encoding(x, packed, prev_state=None):
    """Single forward step, matching the PyTorch module's forward().
    Returns (output (B, D), temporal_state (B, E), sparsity scalar).

    TODO(synk): if this cell is stepped over a time sequence, move the time loop
    into the kernel grid (weights at constant index stay resident in VMEM, h
    carried in scratch) instead of re-launching per step; a faithful sequence
    version must also reproduce the in-kernel threshold.data update."""
    B, D = x.shape
    assert D == packed["D"]
    E, D_P, E_P, G_P = packed["E"], packed["D_P"], packed["E_P"], packed["G_P"]

    BM = min(_round_up(B, 8), 512)            # batch tile (sublane aligned)
    n_tiles = (B + BM - 1) // BM
    B_pad = n_tiles * BM

    x_p = jnp.zeros((B_pad, D_P), jnp.float32).at[:B, :D].set(x.astype(jnp.float32))
    if prev_state is None:
        h0_p = jnp.zeros((B_pad, E_P), jnp.float32)
    elif prev_state.shape == (B_pad, E_P):    # already-padded state accepted as-is
        h0_p = prev_state.astype(jnp.float32)
    else:
        h0_p = jnp.zeros((B_pad, E_P), jnp.float32).at[:B, :E].set(
            prev_state.astype(jnp.float32))

    kernel = functools.partial(_dse_kernel, e=E, d_pad=D_P, e_pad=E_P)

    args = (x_p, packed["w1"], packed["b1"], packed["thr"],
            packed["w_ih"], packed["b_ih"], packed["w_hh"], packed["b_hh"],
            packed["w_rec"], packed["b_rec"], h0_p)

    def const2d(a):                            # weights: resident, fetched once
        return pl.BlockSpec(a.shape, lambda i: (0, 0))

    in_specs = [
        pl.BlockSpec((BM, D_P), lambda i: (i, 0)),     # x, blocked over batch tiles
        const2d(packed["w1"]), const2d(packed["b1"]),
        pl.BlockSpec(memory_space=pltpu.SMEM),         # threshold scalar
        const2d(packed["w_ih"]), const2d(packed["b_ih"]),
        const2d(packed["w_hh"]), const2d(packed["b_hh"]),
        const2d(packed["w_rec"]), const2d(packed["b_rec"]),
        pl.BlockSpec((BM, E_P), lambda i: (i, 0)),     # prev_state
    ]
    out_spec = pl.BlockSpec((BM, D_P + E_P), lambda i: (i, 0))
    out_shape = jax.ShapeDtypeStruct((B_pad, D_P + E_P), jnp.float32)

    # Advisory cost + VMEM budget (v7x: 64 MiB physical, 32 MiB default scoped).
    weight_bytes = sum(int(a.size) * a.dtype.itemsize for a in args[1:3] + args[4:10])
    act_bytes = 4 * (B_pad * D_P + 2 * B_pad * E_P + B_pad * (D_P + E_P))
    cost = pl.CostEstimate(
        flops=2 * B_pad * (D_P * E_P + 2 * E_P * G_P + E_P * D_P),
        transcendentals=3 * B_pad * E,
        bytes_accessed=int(weight_bytes + act_bytes))
    act_tile_bytes = 4 * BM * (2 * D_P + 3 * E_P)
    vmem_limit = int(min(max(2 * weight_bytes + 4 * act_tile_bytes + (8 << 20),
                             32 << 20), 64 << 20))

    slab = pl.pallas_call(
        kernel,
        grid=(n_tiles,),
        in_specs=in_specs,
        out_specs=out_spec,
        out_shape=out_shape,
        compiler_params=pltpu.CompilerParams(
            dimension_semantics=("parallel",),
            vmem_limit_bytes=vmem_limit),
        cost_estimate=cost,
    )(*args)

    out = slab[:B, :D]
    state = slab[:B, D_P:D_P + E]
    sparsity = jnp.sum(slab[:B, D_P + E]) * (1.0 / float(B * E))
    return out, state, sparsity


def init_params(key, input_dim):
    """Deterministic parameter init matching the PyTorch module's shapes."""
    encoding_dim = max(32, int(np.log2(input_dim)))
    D, E = input_dim, encoding_dim
    ks = jax.random.split(key, 10)

    def unif(k, shape, bound):
        return jax.random.uniform(k, shape, jnp.float32, -bound, bound)

    b_lin = 1.0 / np.sqrt(D)
    b_gru = 1.0 / np.sqrt(E)
    params = {
        # sparse_proj Linear(D -> E): stored transposed as (D, E)
        "w1": unif(ks[0], (D, E), b_lin),
        "b1": unif(ks[1], (1, E), b_lin),
        # F.threshold parameter (init 0.5, like torch.ones(1) * 0.5)
        "thr": jnp.full((1,), 0.5, jnp.float32),
        # GRUCell(E -> E): weight_ih / weight_hh stored transposed as (E, 3E)
        "w_ih": unif(ks[2], (E, 3 * E), b_gru),
        "w_hh": unif(ks[3], (E, 3 * E), b_gru),
        "b_ih": unif(ks[4], (1, 3 * E), b_gru),
        "b_hh": unif(ks[5], (1, 3 * E), b_gru),
        # reconstruct Linear(E -> D): stored transposed as (E, D)
        "w_rec": unif(ks[6], (E, D), b_gru),
        "b_rec": unif(ks[7], (1, D), b_gru),
    }
    return params, encoding_dim


def reference(x, params, prev_state):
    """Pure-JAX reference of the PyTorch forward (dropout in eval mode)."""
    pre = x @ params["w1"] + params["b1"]
    enc = jnp.clip(pre, 0.0, 6.0)
    thr = params["thr"][0]
    enc = jnp.where(enc > thr, enc, 0.0)
    sparsity = jnp.mean((enc > 0.0).astype(jnp.float32))
    h = prev_state
    gi = enc @ params["w_ih"] + params["b_ih"]
    gh = h @ params["w_hh"] + params["b_hh"]
    E = h.shape[1]
    r = jax.nn.sigmoid(gi[:, 0:E] + gh[:, 0:E])
    z = jax.nn.sigmoid(gi[:, E:2 * E] + gh[:, E:2 * E])
    n = jnp.tanh(gi[:, 2 * E:3 * E] + r * gh[:, 2 * E:3 * E])
    h_new = (1.0 - z) * n + z * h
    out = h_new @ params["w_rec"] + params["b_rec"]
    return out, h_new, sparsity


if __name__ == "__main__":
    key = jax.random.PRNGKey(0)
    k_param, k_x = jax.random.split(key)

    batch, input_dim = 8, 64
    params, encoding_dim = init_params(k_param, input_dim)
    packed = pack_params(params)                      # f32 weights (bf16 optional)
    x = jax.random.normal(k_x, (batch, input_dim), jnp.float32)

    out, state, sparsity = dynamic_sparse_encoding(x, packed, prev_state=None)
    out = jax.block_until_ready(out)
    state = jax.block_until_ready(state)
    sparsity = jax.block_until_ready(sparsity)

    # correctness check against a pure-JAX reference
    ref_out, ref_state, ref_sp = reference(
        x, params, jnp.zeros((batch, encoding_dim), jnp.float32))
    np.testing.assert_allclose(np.asarray(out), np.asarray(ref_out), rtol=1e-5, atol=1e-5)
    np.testing.assert_allclose(np.asarray(state), np.asarray(ref_state), rtol=1e-5, atol=1e-5)
    np.testing.assert_allclose(np.asarray(sparsity), np.asarray(ref_sp), rtol=1e-5, atol=1e-5)

    print("KERNEL_OK")
</pallas_src>

<mosaic_0001>
module attributes {stable_mosaic.version = 11 : i64} {
  func.func @_dse_kernel(%arg0: i32, %arg1: memref<8x128xf32, #tpu.memory_space<vmem>>, %arg2: memref<128x128xf32, #tpu.memory_space<vmem>>, %arg3: memref<1x128xf32, #tpu.memory_space<vmem>>, %arg4: memref<1xf32, #tpu.memory_space<smem>>, %arg5: memref<128x128xf32, #tpu.memory_space<vmem>>, %arg6: memref<1x128xf32, #tpu.memory_space<vmem>>, %arg7: memref<128x128xf32, #tpu.memory_space<vmem>>, %arg8: memref<1x128xf32, #tpu.memory_space<vmem>>, %arg9: memref<128x128xf32, #tpu.memory_space<vmem>>, %arg10: memref<1x128xf32, #tpu.memory_space<vmem>>, %arg11: memref<8x128xf32, #tpu.memory_space<vmem>>, %arg12: memref<8x256xf32, #tpu.memory_space<vmem>>) attributes {dimension_semantics = [#tpu.dimension_semantics<parallel>], iteration_bounds = array<i64: 1>, scalar_prefetch = 0 : i64, scratch_operands = 0 : i64, tpu.core_type = #tpu.core_type<tc>, window_params = [{transform_indices = @transform_0, window_bounds = array<i64: 8, 128>}, {pipeline_mode = #tpu.pipeline_mode<synchronous>, transform_indices = @transform_1, window_bounds = array<i64: 128, 128>}, {pipeline_mode = #tpu.pipeline_mode<synchronous>, transform_indices = @transform_2, window_bounds = array<i64: 1, 128>}, {transform_indices = @transform_3, window_bounds = array<i64: 1>}, {pipeline_mode = #tpu.pipeline_mode<synchronous>, transform_indices = @transform_4, window_bounds = array<i64: 128, 128>}, {pipeline_mode = #tpu.pipeline_mode<synchronous>, transform_indices = @transform_5, window_bounds = array<i64: 1, 128>}, {pipeline_mode = #tpu.pipeline_mode<synchronous>, transform_indices = @transform_6, window_bounds = array<i64: 128, 128>}, {pipeline_mode = #tpu.pipeline_mode<synchronous>, transform_indices = @transform_7, window_bounds = array<i64: 1, 128>}, {pipeline_mode = #tpu.pipeline_mode<synchronous>, transform_indices = @transform_8, window_bounds = array<i64: 128, 128>}, {pipeline_mode = #tpu.pipeline_mode<synchronous>, transform_indices = @transform_9, window_bounds = array<i64: 1, 128>}, {transform_indices = @transform_10, window_bounds = array<i64: 8, 128>}, {transform_indices = @transform_11, window_bounds = array<i64: 8, 256>}]} {
    %c0 = arith.constant 0 : index
    %c0_0 = arith.constant 0 : index
    %0 = vector.load %arg1[%c0, %c0_0] : memref<8x128xf32, #tpu.memory_space<vmem>>, vector<8x128xf32>
    %c0_1 = arith.constant 0 : index
    %c0_2 = arith.constant 0 : index
    %1 = vector.load %arg11[%c0_1, %c0_2] : memref<8x128xf32, #tpu.memory_space<vmem>>, vector<8x128xf32>
    %c0_3 = arith.constant 0 : index
    %c0_4 = arith.constant 0 : index
    %2 = vector.load %arg2[%c0_3, %c0_4] : memref<128x128xf32, #tpu.memory_space<vmem>>, vector<128x128xf32>
    %cst = arith.constant dense<0.000000e+00> : vector<8x128xf32>
    %3 = tpu.matmul %0, %2, %cst {dimension_numbers = #tpu.dot_dimension_numbers<[1], [0], [0], [1], [0, 0, 1, 1], [], []>} : vector<8x128xf32>, vector<128x128xf32>, vector<8x128xf32> -> vector<8x128xf32>
    %c0_5 = arith.constant 0 : index
    %c0_6 = arith.constant 0 : index
    %4 = vector.load %arg3[%c0_5, %c0_6] : memref<1x128xf32, #tpu.memory_space<vmem>>, vector<1x128xf32>
    %5 = vector.broadcast %4 : vector<1x128xf32> to vector<8x128xf32>
    %6 = arith.addf %3, %5 : vector<8x128xf32>
    %c0_7 = arith.constant 0 : index
    %7 = memref.load %arg4[%c0_7] : memref<1xf32, #tpu.memory_space<smem>>
    %cst_8 = arith.constant 0.000000e+00 : f32
    %8 = arith.maximumf %7, %cst_8 : f32
    %cst_9 = arith.constant 6.000000e+00 : f32
    %9 = vector.broadcast %cst_9 : f32 to vector<8x128xf32>
    %10 = arith.minimumf %6, %9 : vector<8x128xf32>
    %11 = vector.broadcast %8 : f32 to vector<8x128xf32>
    %12 = arith.cmpf ogt, %10, %11 : vector<8x128xf32>
    %cst_10 = arith.constant 0.000000e+00 : f32
    %13 = vector.broadcast %cst_10 : f32 to vector<8x128xf32>
    %14 = arith.select %12, %10, %13 : vector<8x128xi1>, vector<8x128xf32>
    %cst_11 = arith.constant 0.000000e+00 : f32
    %15 = vector.broadcast %cst_11 : f32 to vector<8x128xf32>
    %16 = arith.cmpf ogt, %14, %15 : vector<8x128xf32>
    %17 = arith.extui %16 : vector<8x128xi1> to vector<8x128xi32>
    %18 = arith.sitofp %17 : vector<8x128xi32> to vector<8x128xf32>
    %cst_12 = arith.constant dense<0.000000e+00> : vector<8xf32>
    %19 = vector.multi_reduction <add>, %18, %cst_12 [1] : vector<8x128xf32> to vector<8xf32>
    %20 = vector.shape_cast %19 : vector<8xf32> to vector<8x1xf32>
    %c0_13 = arith.constant 0 : index
    %c0_14 = arith.constant 0 : index
    %21 = vector.load %arg5[%c0_13, %c0_14] : memref<128x128xf32, #tpu.memory_space<vmem>>, vector<128x128xf32>
    %cst_15 = arith.constant dense<0.000000e+00> : vector<8x128xf32>
    %22 = tpu.matmul %14, %21, %cst_15 {dimension_numbers = #tpu.dot_dimension_numbers<[1], [0], [0], [1], [0, 0, 1, 1], [], []>} : vector<8x128xf32>, vector<128x128xf32>, vector<8x128xf32> -> vector<8x128xf32>
    %c0_16 = arith.constant 0 : index
    %c0_17 = arith.constant 0 : index
    %23 = vector.load %arg6[%c0_16, %c0_17] : memref<1x128xf32, #tpu.memory_space<vmem>>, vector<1x128xf32>
    %24 = vector.broadcast %23 : vector<1x128xf32> to vector<8x128xf32>
    %25 = arith.addf %22, %24 : vector<8x128xf32>
    %c0_18 = arith.constant 0 : index
    %c0_19 = arith.constant 0 : index
    %26 = vector.load %arg7[%c0_18, %c0_19] : memref<128x128xf32, #tpu.memory_space<vmem>>, vector<128x128xf32>
    %cst_20 = arith.constant dense<0.000000e+00> : vector<8x128xf32>
    %27 = tpu.matmul %1, %26, %cst_20 {dimension_numbers = #tpu.dot_dimension_numbers<[1], [0], [0], [1], [0, 0, 1, 1], [], []>} : vector<8x128xf32>, vector<128x128xf32>, vector<8x128xf32> -> vector<8x128xf32>
    %c0_21 = arith.constant 0 : index
    %c0_22 = arith.constant 0 : index
    %28 = vector.load %arg8[%c0_21, %c0_22] : memref<1x128xf32, #tpu.memory_space<vmem>>, vector<1x128xf32>
    %29 = vector.broadcast %28 : vector<1x128xf32> to vector<8x128xf32>
    %30 = arith.addf %27, %29 : vector<8x128xf32>
    %31 = vector.extract_strided_slice %25 {offsets = [0, 0], sizes = [8, 32], strides = [1, 1]} : vector<8x128xf32> to vector<8x32xf32>
    %32 = vector.extract_strided_slice %30 {offsets = [0, 0], sizes = [8, 32], strides = [1, 1]} : vector<8x128xf32> to vector<8x32xf32>
    %33 = arith.addf %31, %32 : vector<8x32xf32>
    %34 = arith.negf %33 : vector<8x32xf32>
    %35 = math.exp %34 : vector<8x32xf32>
    %cst_23 = arith.constant 1.000000e+00 : f32
    %36 = vector.broadcast %cst_23 : f32 to vector<8x32xf32>
    %37 = arith.addf %36, %35 : vector<8x32xf32>
    %38 = arith.divf %36, %37 : vector<8x32xf32>
    %39 = vector.extract_strided_slice %25 {offsets = [0, 32], sizes = [8, 32], strides = [1, 1]} : vector<8x128xf32> to vector<8x32xf32>
    %40 = vector.extract_strided_slice %30 {offsets = [0, 32], sizes = [8, 32], strides = [1, 1]} : vector<8x128xf32> to vector<8x32xf32>
    %41 = arith.addf %39, %40 : vector<8x32xf32>
    %42 = arith.negf %41 : vector<8x32xf32>
    %43 = math.exp %42 : vector<8x32xf32>
    %cst_24 = arith.constant 1.000000e+00 : f32
    %44 = vector.broadcast %cst_24 : f32 to vector<8x32xf32>
    %45 = arith.addf %44, %43 : vector<8x32xf32>
    %46 = arith.divf %44, %45 : vector<8x32xf32>
    %47 = vector.extract_strided_slice %25 {offsets = [0, 64], sizes = [8, 32], strides = [1, 1]} : vector<8x128xf32> to vector<8x32xf32>
    %48 = vector.extract_strided_slice %30 {offsets = [0, 64], sizes = [8, 32], strides = [1, 1]} : vector<8x128xf32> to vector<8x32xf32>
    %49 = arith.mulf %38, %48 : vector<8x32xf32>
    %50 = arith.addf %47, %49 : vector<8x32xf32>
    %51 = math.tanh %50 : vector<8x32xf32>
    %cst_25 = arith.constant 1.000000e+00 : f32
    %52 = vector.broadcast %cst_25 : f32 to vector<8x32xf32>
    %53 = arith.subf %52, %46 : vector<8x32xf32>
    %54 = arith.mulf %53, %51 : vector<8x32xf32>
    %55 = vector.extract_strided_slice %1 {offsets = [0, 0], sizes = [8, 32], strides = [1, 1]} : vector<8x128xf32> to vector<8x32xf32>
    %56 = arith.mulf %46, %55 : vector<8x32xf32>
    %57 = arith.addf %54, %56 : vector<8x32xf32>
    %cst_26 = arith.constant 0.000000e+00 : f32
    %58 = vector.broadcast %cst_26 : f32 to vector<8x96xf32>
    %59 = tpu.concatenate %57, %58 in 1 : vector<8x32xf32>, vector<8x96xf32> -> vector<8x128xf32>
    %60 = tpu.iota {dimensions = array<i32: 1>} : vector<8x128xi32>
    %c32_i32 = arith.constant 32 : i32
    %61 = vector.broadcast %c32_i32 : i32 to vector<8x128xi32>
    %62 = arith.cmpi eq, %60, %61 : vector<8x128xi32>
    %63 = vector.shape_cast %20 : vector<8x1xf32> to vector<8x1xf32>
    %64 = vector.broadcast %63 : vector<8x1xf32> to vector<8x128xf32>
    %65 = arith.select %62, %64, %59 : vector<8x128xi1>, vector<8x128xf32>
    %c0_27 = arith.constant 0 : index
    %c0_28 = arith.constant 0 : index
    %66 = vector.load %arg9[%c0_27, %c0_28] : memref<128x128xf32, #tpu.memory_space<vmem>>, vector<128x128xf32>
    %cst_29 = arith.constant dense<0.000000e+00> : vector<8x128xf32>
    %67 = tpu.matmul %65, %66, %cst_29 {dimension_numbers = #tpu.dot_dimension_numbers<[1], [0], [0], [1], [0, 0, 1, 1], [], []>} : vector<8x128xf32>, vector<128x128xf32>, vector<8x128xf32> -> vector<8x128xf32>
    %c0_30 = arith.constant 0 : index
    %c0_31 = arith.constant 0 : index
    %68 = vector.load %arg10[%c0_30, %c0_31] : memref<1x128xf32, #tpu.memory_space<vmem>>, vector<1x128xf32>
    %69 = vector.broadcast %68 : vector<1x128xf32> to vector<8x128xf32>
    %70 = arith.addf %67, %69 : vector<8x128xf32>
    %c0_32 = arith.constant 0 : index
    %c0_33 = arith.constant 0 : index
    %71 = vector.load %arg12[%c0_32, %c0_33] : memref<8x256xf32, #tpu.memory_space<vmem>>, vector<8x128xf32>
    tpu.vector_store %arg12[%c0_32, %c0_33], %70 {strides = array<i32>} : memref<8x256xf32, #tpu.memory_space<vmem>>, vector<8x128xf32>,
    %c0_34 = arith.constant 0 : index
    %c128 = arith.constant 128 : index
    %72 = vector.load %arg12[%c0_34, %c128] : memref<8x256xf32, #tpu.memory_space<vmem>>, vector<8x128xf32>
    tpu.vector_store %arg12[%c0_34, %c128], %65 {strides = array<i32>} : memref<8x256xf32, #tpu.memory_space<vmem>>, vector<8x128xf32>,
    return
  }
  func.func @transform_0(%arg0: i32) -> (i32, i32) {
    %c0_i32 = arith.constant 0 : i32
    %c0_i32_0 = arith.constant 0 : i32
    return %arg0, %c0_i32 : i32, i32
  }
  func.func @transform_1(%arg0: i32) -> (i32, i32) {
    %c0_i32 = arith.constant 0 : i32
    %c0_i32_0 = arith.constant 0 : i32
    %c0_i32_1 = arith.constant 0 : i32
    return %c0_i32, %c0_i32_0 : i32, i32
  }
  func.func @transform_2(%arg0: i32) -> (i32, i32) {
    %c0_i32 = arith.constant 0 : i32
    %c0_i32_0 = arith.constant 0 : i32
    %c0_i32_1 = arith.constant 0 : i32
    return %c0_i32, %c0_i32_0 : i32, i32
  }
  func.func @transform_3(%arg0: i32) -> i32 {
    %c0_i32 = arith.constant 0 : i32
    %c0_i32_0 = arith.constant 0 : i32
    return %c0_i32 : i32
  }
  func.func @transform_4(%arg0: i32) -> (i32, i32) {
    %c0_i32 = arith.constant 0 : i32
    %c0_i32_0 = arith.constant 0 : i32
    %c0_i32_1 = arith.constant 0 : i32
    return %c0_i32, %c0_i32_0 : i32, i32
  }
  func.func @transform_5(%arg0: i32) -> (i32, i32) {
    %c0_i32 = arith.constant 0 : i32
    %c0_i32_0 = arith.constant 0 : i32
    %c0_i32_1 = arith.constant 0 : i32
    return %c0_i32, %c0_i32_0 : i32, i32
  }
  func.func @transform_6(%arg0: i32) -> (i32, i32) {
    %c0_i32 = arith.constant 0 : i32
    %c0_i32_0 = arith.constant 0 : i32
    %c0_i32_1 = arith.constant 0 : i32
    return %c0_i32, %c0_i32_0 : i32, i32
  }
  func.func @transform_7(%arg0: i32) -> (i32, i32) {
    %c0_i32 = arith.constant 0 : i32
    %c0_i32_0 = arith.constant 0 : i32
    %c0_i32_1 = arith.constant 0 : i32
    return %c0_i32, %c0_i32_0 : i32, i32
  }
  func.func @transform_8(%arg0: i32) -> (i32, i32) {
    %c0_i32 = arith.constant 0 : i32
    %c0_i32_0 = arith.constant 0 : i32
    %c0_i32_1 = arith.constant 0 : i32
    return %c0_i32, %c0_i32_0 : i32, i32
  }
  func.func @transform_9(%arg0: i32) -> (i32, i32) {
    %c0_i32 = arith.constant 0 : i32
    %c0_i32_0 = arith.constant 0 : i32
    %c0_i32_1 = arith.constant 0 : i32
    return %c0_i32, %c0_i32_0 : i32, i32
  }
  func.func @transform_10(%arg0: i32) -> (i32, i32) {
    %c0_i32 = arith.constant 0 : i32
    %c0_i32_0 = arith.constant 0 : i32
    return %arg0, %c0_i32 : i32, i32
  }
  func.func @transform_11(%arg0: i32) -> (i32, i32) {
    %c0_i32 = arith.constant 0 : i32
    %c0_i32_0 = arith.constant 0 : i32
    return %arg0, %c0_i32 : i32, i32
  }
}

</mosaic_0001>

<bundles_post_ra>
// kernel: tpu_custom_call.1
= control target key start
LH: loop header
LB: loop body
LE: loop exit
PB: predicated region body
PF: predicated region fallthrough
CT: control target
= control target key end

     0   :  { %17 = vsyncpa [#allocation4], 0  ;;  %s750_s0 = inlined_call_operand.hbm [shape: f32[8,128], index: 0, kind: input, shape index: {}]   ;;  %s751_s1 = inlined_call_operand.hbm [shape: f32[128,128], index: 1, kind: input, shape index: {}]   ;;  %s752_s2 = inlined_call_operand.vmem [shape: f32[1,128], index: 2, kind: input, shape index: {}]   ;;  %s753_s3 = inlined_call_operand.<no memory space> [shape: f32[1], index: 3, kind: input, shape index: {}]   ;;  %s754_s4 = inlined_call_operand.hbm [shape: f32[128,128], index: 4, kind: input, shape index: {}]   ;;  %s755_s5 = inlined_call_operand.vmem [shape: f32[1,128], index: 5, kind: input, shape index: {}]   ;;  %s756_s6 = inlined_call_operand.hbm [shape: f32[128,128], index: 6, kind: input, shape index: {}]   ;;  %s757_s7 = inlined_call_operand.hbm [shape: f32[1,128], index: 7, kind: input, shape index: {}]   ;;  %s758_s8 = inlined_call_operand.hbm [shape: f32[128,128], index: 8, kind: input, shape index: {}]   ;;  %s759_s9 = inlined_call_operand.hbm [shape: f32[1,128], index: 9, kind: input, shape index: {}]   ;;  %s760_s10 = inlined_call_operand.vmem [shape: f32[8,128], index: 10, kind: input, shape index: {}]   ;;  %s761_s11 = inlined_call_operand.hbm [shape: f32[8,256], index: 11, kind: output, shape index: {}]  }
   0x1   :  { %18 = vsyncpa [#allocation7], 0 }
   0x2   :  { %19 = vsyncpa [#allocation10], 0 }
   0x3   :  { %20 = vsyncpa [#allocation13], 0  ;;  %s37_s19 = sshll.u32 %s751_s1, 4  ;;  %s38_s19 = int_to_ptr.hbm [resolvable:$true] %s37_s19 }
   0x4   :  { %21 = vsyncpa [#allocation5], 0  ;;  %s621_s20 = smov [#allocation6]   ;;  %s69_s24 = sshll.u32 %s756_s6, 4  ;;  %s70_s24 = int_to_ptr.hbm [resolvable:$true] %s69_s24 }
   0x5   :  { %s39_s21 = sshll.u32 %s621_s20, 4  ;;  %s622_s25 = smov 128   ;;  %s40_s21 = int_to_ptr.vmem [resolvable:$true] %s39_s21 }
   0x6   :  { %s623_s26 = smov 8   ;;  %s624_s27 = smov [#allocation9]  }
   0x7   :  { %45 = dma.hbm_to_vmem [thread:$0]  %s38_s19, 2048, %s40_s21, [#allocation7], %s622_s25, %s622_s25, %s623_s26  }
   0x8   :  { %s71_s28 = sshll.u32 %s624_s27, 4  ;;  %s93_s30 = sshll.u32 %s758_s8, 4  ;;  %s72_s28 = int_to_ptr.vmem [resolvable:$true] %s71_s28  ;;  %s94_s30 = int_to_ptr.hbm [resolvable:$true] %s93_s30 }
   0x9   :  { %77 = dma.hbm_to_vmem [thread:$0]  %s70_s24, 2048, %s72_s28, [#allocation10], %s622_s25, %s622_s25, %s623_s26  }
   0xa   :  { %s27_s13 = sshll.u32 %s750_s0, 4  ;;  %s625_s14 = smov [#allocation12]   ;;  %s28_s13 = int_to_ptr.hbm [resolvable:$true] %s27_s13 }
   0xb   :  { %s95_s15 = sshll.u32 %s625_s14, 4  ;;  %s626_s16 = smov [#allocation3]   ;;  %s96_s15 = int_to_ptr.vmem [resolvable:$true] %s95_s15 }
   0xc   :  { %101 = dma.hbm_to_vmem [thread:$0]  %s94_s30, 2048, %s96_s15, [#allocation13], %s622_s25, %s622_s25, %s623_s26  }
   0xd   :  { %s29_s8 = sshll.u32 %s626_s16, 4  ;;  %s54_s19 = sshll.u32 %s754_s4, 4  ;;  %s30_s8 = int_to_ptr.vmem [resolvable:$true] %s29_s8  ;;  %s55_s19 = int_to_ptr.hbm [resolvable:$true] %s54_s19 }
   0xe   :  { %32 = dma.hbm_to_vmem [thread:$0]  %s28_s13, 128, %s30_s8, [#allocation4]  }
   0xf   :  { %s83_s0 = sshll.u32 %s757_s7, 4  ;;  %s627_s22 = smov [#allocation8]   ;;  %s84_s0 = int_to_ptr.hbm [resolvable:$true] %s83_s0 }
  0x10   :  { %s56_s23 = sshll.u32 %s627_s22, 4  ;;  %s628_s24 = smov [#allocation11]   ;;  %s57_s23 = int_to_ptr.vmem [resolvable:$true] %s56_s23 }
  0x11   :  { %62 = dma.hbm_to_vmem [thread:$0]  %s55_s19, 2048, %s57_s23, [#allocation7], %s622_s25, %s622_s25, %s623_s26  }
  0x12   :  { %s85_s27 = sshll.u32 %s628_s24, 4  ;;  %s107_s4 = sshll.u32 %s759_s9, 4  ;;  %s86_s27 = int_to_ptr.vmem [resolvable:$true] %s85_s27  ;;  %s108_s4 = int_to_ptr.hbm [resolvable:$true] %s107_s4 }
  0x13   :  { %88 = dma.hbm_to_vmem [thread:$0]  %s84_s0, 16, %s86_s27, [#allocation10]  }
  0x14   :  { %s629_s1 = smov [#allocation14]  }
  0x15   :  { %s109_s30 = sshll.u32 %s629_s1, 4  ;;  %s110_s30 = int_to_ptr.vmem [resolvable:$true] %s109_s30 }
  0x16   :  { %112 = dma.hbm_to_vmem [thread:$0]  %s108_s4, 16, %s110_s30, [#allocation13]  }
  0x17   :  { %611 = dma.done.wait [#allocation4], 128  }
  0x18   :  { %612 = vsyncadd [#allocation4], 4294967168 }
  0x19   :  { %613 = dma.done.wait [#allocation7], 4096  }
  0x1a   :  { %614 = vsyncadd [#allocation7], 4294963200 }
  0x1b   :  { %615 = dma.done.wait [#allocation10], 2064  }
  0x1c   :  { %616 = vsyncadd [#allocation10], 4294965232 }
  0x1d   :  { %617 = dma.done.wait [#allocation13], 2064  }
  0x1e   :  { %618 = vsyncadd [#allocation13], 4294965232  ;;  %v160_v0 = vld [vmem:[#allocation6 + $0x78] sm:$0xff]  ;;  %v159_v1 = vld [vmem:[#allocation6 + $0x70] sm:$0xff]  ;;  %s630_s6 = smov 0.0   ;;  %v631_v56 = vmov 0.0  }
  0x1f   :  { %165 = vmatpush.msra.mxu0 %v160_v0  ;;  %v158_v2 = vld [vmem:[#allocation6 + $0x68] sm:$0xff]  ;;  %v157_v3 = vld [vmem:[#allocation6 + $0x60] sm:$0xff]  ;;  %v251_v4 = vld [vmem:[#allocation9 + $0x78] sm:$0xff]  ;;  %s186_s13 = smax.f32 %s630_s6, %s753_s3  ;;  %s633_s3 = smov 96   ;;  %vm323_vm6 = vcmask 261120  }
  0x20   :  { %v156_v5 = vld [vmem:[#allocation6 + $0x58] sm:$0xff]  ;;  %256 = vmatpush.msra.mxu2 %v251_v4  ;;  %v250_v6 = vld [vmem:[#allocation9 + $0x70] sm:$0xff]  ;;  %v249_v7 = vld [vmem:[#allocation9 + $0x68] sm:$0xff]  ;;  %v188_v53 = vstv %s186_s13  ;;  %s635_s16 = smov [#allocation15]   ;;  %s378_s19 = sshll.u32 %s761_s11, 4  ;;  %s379_s19 = int_to_ptr.hbm [resolvable:$true] %s378_s19 }
  0x21   :  { %166 = vmatpush.msra.mxu0 %v159_v1  ;;  %v155_v8 = vld [vmem:[#allocation6 + $0x50] sm:$0xff]  ;;  %v248_v9 = vld [vmem:[#allocation9 + $0x60] sm:$0xff]  ;;  %v154_v10 = vld [vmem:[#allocation6 + $0x48] sm:$0xff]  ;;  %s376_s8 = sshll.u32 %s635_s16, 4  ;;  %s377_s8 = int_to_ptr.vmem [resolvable:$true] %s376_s8 }
  0x22   :  { %257 = vmatpush.msra.mxu2 %v250_v6  ;;  %v247_v11 = vld [vmem:[#allocation9 + $0x58] sm:$0xff]  ;;  %v210_v13 = vld [vmem:[#allocation8 + $0x70] sm:$0xff]  ;;  %v153_v14 = vld [vmem:[#allocation6 + $0x40] sm:$0xff] }
  0x23   :  { %167 = vmatpush.msra.mxu0 %v158_v2  ;;  %v211_v12 = vld [vmem:[#allocation8 + $0x78] sm:$0xff]  ;;  %v246_v15 = vld [vmem:[#allocation9 + $0x50] sm:$0xff]  ;;  %v209_v16 = vld [vmem:[#allocation8 + $0x68] sm:$0xff] }
  0x24   :  { %258 = vmatpush.msra.mxu2 %v249_v7  ;;  %216 = vmatpush.msra.mxu1 %v211_v12  ;;  %v152_v17 = vld [vmem:[#allocation6 + $0x38] sm:$0xff]  ;;  %v245_v18 = vld [vmem:[#allocation9 + $0x48] sm:$0xff]  ;;  %v208_v19 = vld [vmem:[#allocation8 + $0x60] sm:$0xff] }
  0x25   :  { %168 = vmatpush.msra.mxu0 %v157_v3  ;;  %v151_v20 = vld [vmem:[#allocation6 + $0x30] sm:$0xff]  ;;  %v244_v21 = vld [vmem:[#allocation9 + $0x40] sm:$0xff]  ;;  %v207_v22 = vld [vmem:[#allocation8 + $0x58] sm:$0xff] }
  0x26   :  { %259 = vmatpush.msra.mxu2 %v248_v9  ;;  %217 = vmatpush.msra.mxu1 %v210_v13  ;;  %v150_v23 = vld [vmem:[#allocation6 + $0x28] sm:$0xff]  ;;  %v243_v24 = vld [vmem:[#allocation9 + $0x38] sm:$0xff]  ;;  %v206_v25 = vld [vmem:[#allocation8 + $0x50] sm:$0xff] }
  0x27   :  { %169 = vmatpush.msra.mxu0 %v156_v5  ;;  %v149_v26 = vld [vmem:[#allocation6 + $0x20] sm:$0xff]  ;;  %v242_v27 = vld [vmem:[#allocation9 + $0x30] sm:$0xff]  ;;  %v205_v28 = vld [vmem:[#allocation8 + $0x48] sm:$0xff] }
  0x28   :  { %260 = vmatpush.msra.mxu2 %v247_v11  ;;  %218 = vmatpush.msra.mxu1 %v209_v16  ;;  %v148_v29 = vld [vmem:[#allocation6 + $0x18] sm:$0xff]  ;;  %v241_v30 = vld [vmem:[#allocation9 + $0x28] sm:$0xff]  ;;  %v204_v31 = vld [vmem:[#allocation8 + $0x40] sm:$0xff] }
  0x29   :  { %170 = vmatpush.msra.mxu0 %v155_v8  ;;  %v147_v32 = vld [vmem:[#allocation6 + $0x10] sm:$0xff]  ;;  %v240_v33 = vld [vmem:[#allocation9 + $0x20] sm:$0xff]  ;;  %v203_v34 = vld [vmem:[#allocation8 + $0x38] sm:$0xff] }
  0x2a   :  { %261 = vmatpush.msra.mxu2 %v246_v15  ;;  %219 = vmatpush.msra.mxu1 %v208_v19  ;;  %v146_v35 = vld [vmem:[#allocation6 + $0x8] sm:$0xff]  ;;  %v239_v36 = vld [vmem:[#allocation9 + $0x18] sm:$0xff]  ;;  %v202_v37 = vld [vmem:[#allocation8 + $0x30] sm:$0xff] }
  0x2b   :  { %171 = vmatpush.msra.mxu0 %v154_v10  ;;  %v145_v38 = vld [vmem:[#allocation6] sm:$0xff]  ;;  %v143_v39 = vld [vmem:[#allocation3] sm:$0xff]  ;;  %v238_v40 = vld [vmem:[#allocation9 + $0x10] sm:$0xff] }
  0x2c   :  { %262 = vmatpush.msra.mxu2 %v245_v18  ;;  %220 = vmatpush.msra.mxu1 %v207_v22  ;;  %v201_v41 = vld [vmem:[#allocation8 + $0x28] sm:$0xff]  ;;  %v200_v43 = vld [vmem:[#allocation8 + $0x20] sm:$0xff]  ;;  %v732_v45 = vld [vmem:[%s760_s10] sm:$0xff] }
  0x2d   :  { %172 = vmatpush.msra.mxu0 %v153_v14  ;;  %v237_v42 = vld [vmem:[#allocation9 + $0x8] sm:$0xff]  ;;  %v236_v44 = vld [vmem:[#allocation9] sm:$0xff]  ;;  %v199_v46 = vld [vmem:[#allocation8 + $0x18] sm:$0xff] }
  0x2e   :  { %263 = vmatpush.msra.mxu2 %v244_v21  ;;  %221 = vmatpush.msra.mxu1 %v206_v25  ;;  %v198_v47 = vld [vmem:[#allocation8 + $0x10] sm:$0xff]  ;;  %v197_v48 = vld [vmem:[#allocation8 + $0x8] sm:$0xff]  ;;  %v196_v49 = vld [vmem:[#allocation8] sm:$0xff] }
  0x2f   :  { %173 = vmatpush.msra.mxu0 %v152_v17  ;;  %v409_v50 = vld [vmem:[%s752_s2] ss:$0 sm:$0xff]  ;;  %v410_v58 = vld [vmem:[#allocation11] ss:$0 sm:$0xff]  ;;  %s632_s2 = smov 64   ;;  %v342_v21 = vld [vmem:[#allocation12 + $0x68] sm:$0xff] }
  0x30   :  { %264 = vmatpush.msra.mxu2 %v243_v24  ;;  %222 = vmatpush.msra.mxu1 %v205_v28  ;;  %v411_v61 = vld [vmem:[%s755_s5] ss:$0 sm:$0xff]  ;;  %s634_s5 = smov 32   ;;  %v344_v19 = vld [vmem:[#allocation12 + $0x78] sm:$0xff]  ;;  %v341_v22 = vld [vmem:[#allocation12 + $0x60] sm:$0xff] }
  0x31   :  { %174 = vmatpush.msra.mxu0 %v151_v20  ;;  %v343_v20 = vld [vmem:[#allocation12 + $0x70] sm:$0xff]  ;;  %349 = vmatpush.msra.mxu3 %v344_v19  ;;  %v338_v25 = vld [vmem:[#allocation12 + $0x48] sm:$0xff] }
  0x32   :  { %265 = vmatpush.msra.mxu2 %v242_v27  ;;  %223 = vmatpush.msra.mxu1 %v204_v31  ;;  %v339_v24 = vld [vmem:[#allocation12 + $0x50] sm:$0xff]  ;;  %v336_v27 = vld [vmem:[#allocation12 + $0x38] sm:$0xff]  ;;  %v333_v31 = vld [vmem:[#allocation12 + $0x20] sm:$0xff] }
  0x33   :  { %175 = vmatpush.msra.mxu0 %v150_v23  ;;  %350 = vmatpush.msra.mxu3 %v343_v20  ;;  %v340_v23 = vld [vmem:[#allocation12 + $0x58] sm:$0xff]  ;;  %v335_v28 = vld [vmem:[#allocation12 + $0x30] sm:$0xff] }
  0x34   :  { %266 = vmatpush.msra.mxu2 %v241_v30  ;;  %224 = vmatpush.msra.mxu1 %v203_v34 }
  0x35   :  { %176 = vmatpush.msra.mxu0 %v149_v26  ;;  %351 = vmatpush.msra.mxu3 %v342_v21  ;;  %v337_v26 = vld [vmem:[#allocation12 + $0x40] sm:$0xff] }
  0x36   :  { %267 = vmatpush.msra.mxu2 %v240_v33  ;;  %225 = vmatpush.msra.mxu1 %v202_v37  ;;  %v331_v33 = vld [vmem:[#allocation12 + $0x10] sm:$0xff] }
  0x37   :  { %177 = vmatpush.msra.mxu0 %v148_v29  ;;  %352 = vmatpush.msra.mxu3 %v341_v22  ;;  %v334_v29 = vld [vmem:[#allocation12 + $0x28] sm:$0xff] }
  0x38   :  { %268 = vmatpush.msra.mxu2 %v239_v36  ;;  %226 = vmatpush.msra.mxu1 %v201_v41  ;;  %v325_v41 = vlaneseq }
  0x39   :  { %178 = vmatpush.msra.mxu0 %v147_v32  ;;  %353 = vmatpush.msra.mxu3 %v340_v23  ;;  %v332_v32 = vld [vmem:[#allocation12 + $0x18] sm:$0xff] }
  0x3a   :  { %269 = vmatpush.msra.mxu2 %v238_v40  ;;  %227 = vmatpush.msra.mxu1 %v200_v43  ;;  %v329_v40 = vld [vmem:[#allocation12] sm:$0xff]  ;;  %v326_v43 = vand.u32 127, %v325_v41 }
  0x3b   :  { %179 = vmatpush.msra.mxu0 %v146_v35  ;;  %354 = vmatpush.msra.mxu3 %v339_v24  ;;  %v330_v35 = vld [vmem:[#allocation12 + $0x8] sm:$0xff] }
  0x3c   :  { %270 = vmatpush.msra.mxu2 %v237_v42  ;;  %228 = vmatpush.msra.mxu1 %v199_v46  ;;  %vm327_vm7 = vcmp.eq.s32.totalorder %v326_v43, 32 }
  0x3d   :  { %180 = vmatpush.msra.mxu0 %v145_v38  ;;  %355 = vmatpush.msra.mxu3 %v338_v25 }
  0x3e   :  { %181 = vmatmul.f32.vlgmr.msra.gmra.mxu0 %v143_v39  ;;  %271 = vmatpush.msra.mxu2 %v236_v44 }
  0x3f   :  { %272 = vmatmul.f32.vlgmr.msra.gmra.mxu2 %v732_v45  ;;  %229 = vmatpush.msra.mxu1 %v198_v47  ;;  %v412_v47 = vld [vmem:[#allocation14] ss:$0 sm:$0xff] }
  0x40   :  { %356 = vmatpush.msra.mxu3 %v337_v26 }
  0x41   :  { %230 = vmatpush.msra.mxu1 %v197_v48 }
  0x42   :  { %357 = vmatpush.msra.mxu3 %v336_v27 }
  0x43   :  { %231 = vmatpush.msra.mxu1 %v196_v49 }
  0x44   :  { %358 = vmatpush.msra.mxu3 %v335_v28 }
  0x46   :  { %359 = vmatpush.msra.mxu3 %v334_v29 }
  0x48   :  { %360 = vmatpush.msra.mxu3 %v333_v31 }
  0x4a   :  { %361 = vmatpush.msra.mxu3 %v332_v32 }
  0x4c   :  { %362 = vmatpush.msra.mxu3 %v331_v33 }
  0x4e   :  { %363 = vmatpush.msra.mxu3 %v330_v35 }
  0x50   :  { %364 = vmatpush.msra.mxu3 %v329_v40 }
  0xbb   :  { %v182_v51 = vpop.f32.mrf.mxu0 }
  0xbc   :  { %v183_v52 = vadd.f32 %v409_v50, %v182_v51 }
  0xbe   :  { %v187_v54 = vmin.f32 %v183_v52, 6.0 }
  0xc0   :  { %vm189_vm0 = vcmp.gt.f32.partialorder %v187_v54, %v188_v53 }
  0xc1   :  { %392 = vmatmul.msk.f32.vlgmr.msra.gmra.mxu1 %vm189_vm0, %v187_v54  ;;  %v190_v55 = vsel %vm189_vm0, %v187_v54, 0.0 }
  0xc2   :  { %vm191_vm1 = vcmp.gt.f32.partialorder %v190_v55, 0.0  ;;  %v273_v59 = vpop.f32.mrf.mxu2 }
  0xc3   :  { %v391_v57 = vsel %vm191_vm1, 1.0, %v631_v56  ;;  %v274_v60 = vadd.f32 %v410_v58, %v273_v59 }
  0xc4   :  { %194 = vadd.xlane.f32.xlu2 %v391_v57 }
  0xc5   :  { %297 = vrot.lane.b32.xlu0 %v274_v60, %s632_s2 }
 0x137   :  { %v298_v11 = vpop.permute.xlu0 %297  ;;  %v195_v42 = vpop.xlane.xlu2 %194 }
 0x13e   :  { %v233_v62 = vpop.f32.mrf.mxu1 }
 0x13f   :  { %v234_v63 = vadd.f32 %v411_v61, %v233_v62 }
 0x141   :  { %v276_v0 = vadd.f32 %v274_v60, %v234_v63 }
 0x143   :  { %v393_v1 = vmul.f32 -1.442695, %v276_v0 }
 0x145   :  { %413 = vpow2.f32 %v393_v1 }
 0x14b   :  { %v414_v2 = vpop.eup %413 }
 0x14c   :  { %v280_v3 = vadd.f32 1.0, %v414_v2 }
 0x14e   :  { %415 = vrcp.f32 %v280_v3  ;;  %v292_v7 = vand.u32 2147483648, %v280_v3  ;;  %v290_v9 = vand.u32 2147483647, %v280_v3  ;;  %vm286_vm3 = vweird.f32 %v280_v3 }
 0x150   :  { %v293_v12 = vor.u32 1.1754944e-38, %v292_v7  ;;  %vm291_vm5 = vcmp.eq.f32.partialorder %v290_v9, 8.507059e+37 }
 0x154   :  { %v416_v4 = vpop.eup %415 }
 0x155   :  { %v282_v5 = vmul.f32 %v416_v4, %v280_v3  ;;  %vm287_vm2 = vweird.f32 %v416_v4 }
 0x156   :  { %vm288_vm4 = vmor %vm286_vm3, %vm287_vm2 }
 0x157   :  { %v283_v6 = vsub.f32 1.0, %v282_v5 }
 0x159   :  { %v284_v8 = vmul.f32 %v416_v4, %v283_v6 }
 0x15b   :  { %v285_v10 = vadd.f32 %v416_v4, %v284_v8 }
 0x15d   :  { %v289_v13 = vsel %vm288_vm4, %v416_v4, %v285_v10 }
 0x15e   :  { %v294_v14 = vsel %vm291_vm5, %v293_v12, %v289_v13 }
 0x15f   :  { %v300_v15 = vmul.f32 %v298_v11, %v294_v14  ;;  %v307_v34 = vsub.f32 1.0, %v294_v14 }
 0x161   :  { %302 = vrot.lane.b32.xlu0 %v300_v15, %s632_s2 }
 0x1d3   :  { %v303_v16 = vpop.permute.xlu0 %302 }
 0x1d4   :  { %v305_v17 = vadd.f32 %v303_v16, %v234_v63 }
 0x1d6   :  { %417 = vtanh.f32 %v305_v17 }
 0x1dc   :  { %v418_v18 = vpop.eup %417 }
 0x1dd   :  { %309 = vrot.lane.b32.xlu1 %v418_v18, %s633_s3 }
 0x1e5   :  { %314 = vrot.lane.b32.xlu1 %v732_v45, %s634_s5 }
 0x24f   :  { %v310_v30 = vpop.permute.xlu1 %309 }
 0x250   :  { %v312_v37 = vmul.f32 %v310_v30, %v307_v34 }
 0x257   :  { %v315_v36 = vpop.permute.xlu1 %314 }
 0x258   :  { %v317_v38 = vmul.f32 %v315_v36, %v294_v14 }
 0x25a   :  { %v318_v39 = vadd.f32 %v317_v38, %v312_v37 }
 0x25c   :  { %320 = vrot.lane.b32.xlu2 %v318_v39, %s633_s3 }
 0x2b6   :  { %v321_v44 = vpop.permute.xlu2 %320 }
 0x2b7   :  { %v324_v45 = vsel %vm323_vm6, %v321_v44, 0.0 }
 0x2b8   :  { %v328_v46 = vsel %vm327_vm7, %v195_v42, %v324_v45 }
 0x2b9   :  { %365 = vmatmul.f32.vlgmr.msra.gmra.mxu3 %v328_v46  ;;  %370 = vst [vmem:[#allocation15 + $0x8] sm:$0xff] %v328_v46 }
 0x33c   :  { %v366_v48 = vpop.f32.mrf.mxu3 }
 0x33d   :  { %v367_v49 = vadd.f32 %v412_v47, %v366_v48 }
 0x33f   :  { %369 = vst [vmem:[#allocation15] sm:$0xff] %v367_v49 }
 0x340   :  { %381 = dma.vmem_to_hbm [thread:$0]  %s377_s8, 256, %s379_s19, [#allocation5]  }
 0x341   :  { %619 = dma.done.wait [#allocation5], 256  }
 0x342   :  { %620 = vsyncadd [#allocation5], 4294967040 }
 0x343   :  { %386 = vsyncpa [#allocation4], 1 }
 0x344   :  { %387 = vsyncpa [#allocation7], 1 }
 0x345   :  { %388 = vsyncpa [#allocation10], 1 }
 0x346   :  { %389 = vsyncpa [#allocation13], 1 }
 0x347   :  { %390 = vsyncpa [#allocation5], 1 }

</bundles_post_ra>
